<compile_context>
chip_gen: v7x
topology: tpu7x:2x2x1
jax: 0.10.0
libtpu: 0.0.40
codegen_flags: <defaults>
</compile_context>

<pallas_src>
import functools

import jax
import jax.numpy as jnp
from jax.experimental import pallas as pl
from jax.experimental.pallas import tpu as pltpu


def _nll_sum_kernel(pred_ref, tgt_ref, out_ref, *, n_rows, tiles_per_part):
    """Accumulates sum_n pred[n, target[n]] over this partial's row tiles.

    pred_ref: (TILE_N, C)  native dtype (f32 / bf16)
    tgt_ref : (TILE_N, 1)  int32
    out_ref : (8, 128) f32 accumulator block for this partial (every element
              holds the same running sum -> unmasked lane-dense stores).
    """
    p = pl.program_id(0)          # partial index ("parallel" axis)
    i = pl.program_id(1)          # row-tile index within the partial ("arbitrary")

    @pl.when(i == 0)
    def _init():
        out_ref[...] = jnp.zeros_like(out_ref)

    pred = pred_ref[...].astype(jnp.float32)          # upcast in-vreg, f32 accum
    tgt = tgt_ref[...]                                # (TILE_N, 1) int32
    tn, c = pred.shape

    # One-hot gather via lane-iota == target; reduce the lane axis first
    # (VPU select + XLU lane reduce on different slots), sublanes second.
    col = jax.lax.broadcasted_iota(jnp.int32, (tn, c), 1)
    picked = jnp.where(col == tgt, pred, 0.0)
    per_row = jnp.sum(picked, axis=-1, keepdims=True)     # (TILE_N, 1)

    # Mask rows beyond N (partial last tile / clamped overflow tiles).
    tile_idx = p * tiles_per_part + i
    row = tile_idx * tn + jax.lax.broadcasted_iota(jnp.int32, (tn, 1), 0)
    per_row = jnp.where(row < n_rows, per_row, 0.0)

    tile_sum = jnp.sum(per_row, axis=0, keepdims=True)    # (1, 1)
    out_ref[...] += tile_sum                              # broadcast into (8, 128)


def _choose_tile_n(n, c, itemsize):
    """Row tile that keeps double-buffered pred tiles well under the scoped
    VMEM defaults of every generation (including v7x's 64 MiB VMEM)."""
    c_pad = ((c + 127) // 128) * 128          # class axis pads to 128 lanes
    budget = 6 * 1024 * 1024                  # bytes for the 2 pred buffers
    max_rows = max(32, budget // max(2 * c_pad * itemsize, 1))
    tile = min(n, max_rows, 2048)
    if tile < n:
        tile = max(32, (tile // 32) * 32)     # sublane-aligned for f32/bf16/int8
    return tile


def nll_loss(pred, target, *, tile_n=None, num_partials=None):
    """Mean-reduction NLL loss (== F.nll_loss(pred, target)) via Pallas.

    pred:   (N, C) float32 / bfloat16 log-probabilities (loaded in native
            dtype; accumulation is float32)
    target: (N,) integer class indices in [0, C)
    Returns a float32 scalar.
    """
    # TODO(synk): ignore_index / per-class weights of F.nll_loss are not
    # implemented (the module uses the defaults, so semantics match).
    n, c = pred.shape
    tgt2d = target.astype(jnp.int32).reshape(n, 1)

    itemsize = jnp.dtype(pred.dtype).itemsize
    if tile_n is None:
        tile_n = _choose_tile_n(n, c, itemsize)
    tile_n = int(tile_n)
    if tile_n >= n:
        tile_n = n                               # full-dim block is always legal
    else:
        tile_n = max(32, (tile_n // 32) * 32)
        if tile_n >= n:
            tile_n = n

    num_tiles = pl.cdiv(n, tile_n)
    if num_partials is None:
        num_partials = 2 if num_tiles >= 2 else 1   # v7x: one partial per TC
    num_partials = int(max(1, min(num_partials, num_tiles)))
    tiles_per_part = pl.cdiv(num_tiles, num_partials)

    def row_block(p, i):
        # Clamp overflow tiles (when num_tiles % num_partials != 0); their
        # contribution is masked to zero inside the kernel.
        return (jnp.minimum(p * tiles_per_part + i, num_tiles - 1), 0)

    kernel = functools.partial(
        _nll_sum_kernel, n_rows=n, tiles_per_part=tiles_per_part)

    partial_sums = pl.pallas_call(
        kernel,
        out_shape=jax.ShapeDtypeStruct((num_partials * 8, 128), jnp.float32),
        grid_spec=pltpu.PrefetchScalarGridSpec(
            num_scalar_prefetch=0,
            grid=(num_partials, tiles_per_part),
            in_specs=[
                pl.BlockSpec((tile_n, c), row_block),   # native dtype, no cast
                pl.BlockSpec((tile_n, 1), row_block),
            ],
            out_specs=pl.BlockSpec((8, 128), lambda p, i: (p, 0)),
        ),
        compiler_params=pltpu.CompilerParams(
            dimension_semantics=("parallel", "arbitrary")),
    )(pred, tgt2d)

    partials = partial_sums.reshape(num_partials, 8, 128)[:, 0, 0]
    # Mean reduction: multiply by the compile-time constant -1/N.
    return jnp.sum(partials) * jnp.float32(-1.0 / n)


if __name__ == "__main__":
    key = jax.random.PRNGKey(0)
    k_logits, k_tgt = jax.random.split(key)

    # Small shapes consistent with the part-seg head: 2 clouds x 60 points,
    # num_part = 50 classes  ->  pred (120, 50) log-probabilities.
    B, NPTS, NUM_PART = 2, 60, 50
    N = B * NPTS
    logits = jax.random.normal(k_logits, (N, NUM_PART), dtype=jnp.float32)
    pred = jax.nn.log_softmax(logits, axis=-1)      # what nll_loss expects
    target = jax.random.randint(k_tgt, (N,), 0, NUM_PART, dtype=jnp.int32)

    ref = -jnp.mean(pred[jnp.arange(N), target])

    # 1) Default tiling (single tile at this toy size).
    loss = nll_loss(pred, target)
    jax.block_until_ready(loss)
    assert jnp.allclose(loss, ref, atol=1e-5, rtol=1e-5), (loss, ref)

    # 2) Forced small tiles: exercises the tiled accumulator, the 2-partial
    #    ("parallel") split and the remainder-row masking.
    loss_tiled = nll_loss(pred, target, tile_n=32, num_partials=2)
    jax.block_until_ready(loss_tiled)
    assert jnp.allclose(loss_tiled, ref, atol=1e-5, rtol=1e-5), (loss_tiled, ref)

    # 3) Native bf16 input: no wrapper-side cast, upcast happens in-vreg.
    pred_bf16 = pred.astype(jnp.bfloat16)
    loss_bf16 = nll_loss(pred_bf16, target, tile_n=32, num_partials=2)
    jax.block_until_ready(loss_bf16)
    ref_bf16 = -jnp.mean(pred_bf16.astype(jnp.float32)[jnp.arange(N), target])
    assert jnp.allclose(loss_bf16, ref_bf16, atol=1e-4, rtol=1e-4), (loss_bf16, ref_bf16)

    print("KERNEL_OK")
</pallas_src>

<mosaic_0001>
module attributes {stable_mosaic.version = 11 : i64} {
  func.func @_nll_sum_kernel(%arg0: i32, %arg1: i32, %arg2: memref<120x50xf32, #tpu.memory_space<vmem>>, %arg3: memref<120x1xi32, #tpu.memory_space<vmem>>, %arg4: memref<8x128xf32, #tpu.memory_space<vmem>>) attributes {dimension_semantics = [#tpu.dimension_semantics<parallel>, #tpu.dimension_semantics<arbitrary>], iteration_bounds = array<i64: 1, 1>, scalar_prefetch = 0 : i64, scratch_operands = 0 : i64, tpu.core_type = #tpu.core_type<tc>, window_params = [{transform_indices = @transform_0, window_bounds = array<i64: 120, 50>}, {transform_indices = @transform_1, window_bounds = array<i64: 120, 1>}, {transform_indices = @transform_2, window_bounds = array<i64: 8, 128>}]} {
    %c0_i32 = arith.constant 0 : i32
    %0 = arith.cmpi eq, %arg1, %c0_i32 : i32
    %1 = arith.extui %0 : i1 to i32
    %c0_i32_0 = arith.constant 0 : i32
    %2 = arith.cmpi ne, %1, %c0_i32_0 : i32
    scf.if %2 {
      %cst_12 = arith.constant 0.000000e+00 : f32
      %28 = vector.broadcast %cst_12 : f32 to vector<8x128xf32>
      %c0_13 = arith.constant 0 : index
      %c0_14 = arith.constant 0 : index
      %29 = vector.load %arg4[%c0_13, %c0_14] : memref<8x128xf32, #tpu.memory_space<vmem>>, vector<8x128xf32>
      tpu.vector_store %arg4[%c0_13, %c0_14], %28 {strides = array<i32>} : memref<8x128xf32, #tpu.memory_space<vmem>>, vector<8x128xf32>,
    } else {
    }
    %c0 = arith.constant 0 : index
    %c0_1 = arith.constant 0 : index
    %3 = vector.load %arg2[%c0, %c0_1] : memref<120x50xf32, #tpu.memory_space<vmem>>, vector<120x50xf32>
    %c0_2 = arith.constant 0 : index
    %c0_3 = arith.constant 0 : index
    %4 = vector.load %arg3[%c0_2, %c0_3] : memref<120x1xi32, #tpu.memory_space<vmem>>, vector<120x1xi32>
    %5 = tpu.iota {dimensions = array<i32: 1>} : vector<120x50xi32>
    %6 = vector.broadcast %4 : vector<120x1xi32> to vector<120x50xi32>
    %7 = arith.cmpi eq, %5, %6 : vector<120x50xi32>
    %cst = arith.constant 0.000000e+00 : f32
    %8 = vector.broadcast %cst : f32 to vector<120x50xf32>
    %9 = arith.select %7, %3, %8 : vector<120x50xi1>, vector<120x50xf32>
    %cst_4 = arith.constant dense<0.000000e+00> : vector<120xf32>
    %10 = vector.multi_reduction <add>, %9, %cst_4 [1] : vector<120x50xf32> to vector<120xf32>
    %11 = vector.shape_cast %10 : vector<120xf32> to vector<120x1xf32>
    %c1_i32 = arith.constant 1 : i32
    %12 = arith.muli %arg0, %c1_i32 : i32
    %13 = arith.addi %12, %arg1 : i32
    %c120_i32 = arith.constant 120 : i32
    %14 = arith.muli %13, %c120_i32 : i32
    %15 = tpu.iota {dimensions = array<i32: 0>} : vector<120x1xi32>
    %16 = vector.broadcast %14 : i32 to vector<120x1xi32>
    %17 = arith.addi %16, %15 : vector<120x1xi32>
    %c120_i32_5 = arith.constant 120 : i32
    %18 = vector.broadcast %c120_i32_5 : i32 to vector<120x1xi32>
    %19 = arith.cmpi slt, %17, %18 : vector<120x1xi32>
    %cst_6 = arith.constant 0.000000e+00 : f32
    %20 = vector.broadcast %cst_6 : f32 to vector<120x1xf32>
    %21 = arith.select %19, %11, %20 : vector<120x1xi1>, vector<120x1xf32>
    %cst_7 = arith.constant dense<0.000000e+00> : vector<1xf32>
    %22 = vector.multi_reduction <add>, %21, %cst_7 [0] : vector<120x1xf32> to vector<1xf32>
    %23 = vector.shape_cast %22 : vector<1xf32> to vector<1x1xf32>
    %c0_8 = arith.constant 0 : index
    %c0_9 = arith.constant 0 : index
    %24 = vector.load %arg4[%c0_8, %c0_9] : memref<8x128xf32, #tpu.memory_space<vmem>>, vector<8x128xf32>
    %25 = vector.broadcast %23 : vector<1x1xf32> to vector<8x128xf32>
    %26 = arith.addf %24, %25 : vector<8x128xf32>
    %c0_10 = arith.constant 0 : index
    %c0_11 = arith.constant 0 : index
    %27 = vector.load %arg4[%c0_10, %c0_11] : memref<8x128xf32, #tpu.memory_space<vmem>>, vector<8x128xf32>
    tpu.vector_store %arg4[%c0_10, %c0_11], %26 {strides = array<i32>} : memref<8x128xf32, #tpu.memory_space<vmem>>, vector<8x128xf32>,
    return
  }
  func.func @transform_0(%arg0: i32, %arg1: i32) -> (i32, i32) {
    %c1_i32 = arith.constant 1 : i32
    %0 = arith.muli %arg0, %c1_i32 : i32
    %1 = arith.addi %0, %arg1 : i32
    %c0_i32 = arith.constant 0 : i32
    %2 = arith.minsi %1, %c0_i32 : i32
    %c0_i32_0 = arith.constant 0 : i32
    %c0_i32_1 = arith.constant 0 : i32
    return %2, %c0_i32_0 : i32, i32
  }
  func.func @transform_1(%arg0: i32, %arg1: i32) -> (i32, i32) {
    %c1_i32 = arith.constant 1 : i32
    %0 = arith.muli %arg0, %c1_i32 : i32
    %1 = arith.addi %0, %arg1 : i32
    %c0_i32 = arith.constant 0 : i32
    %2 = arith.minsi %1, %c0_i32 : i32
    %c0_i32_0 = arith.constant 0 : i32
    %c0_i32_1 = arith.constant 0 : i32
    return %2, %c0_i32_0 : i32, i32
  }
  func.func @transform_2(%arg0: i32, %arg1: i32) -> (i32, i32) {
    %c0_i32 = arith.constant 0 : i32
    %c0_i32_0 = arith.constant 0 : i32
    return %arg0, %c0_i32 : i32, i32
  }
}

</mosaic_0001>

<bundles_post_ra>
// kernel: tpu_custom_call.1
= control target key start
LH: loop header
LB: loop body
LE: loop exit
PB: predicated region body
PF: predicated region fallthrough
CT: control target
= control target key end

     0   :  { %v376_v2 = vmov 0   ;;  %s527_s0 = inlined_call_operand.vmem [shape: f32[120,50], index: 0, kind: input, shape index: {}]   ;;  %s528_s1 = inlined_call_operand.vmem [shape: s32[120,1], index: 1, kind: input, shape index: {}]   ;;  %s529_s2 = inlined_call_operand.hbm [shape: f32[8,128], index: 2, kind: output, shape index: {}]  }
   0x1   :  { %v98_v0 = vld [vmem:[%s528_s1 + $0x10] sm:$0xff]  ;;  %v96_v1 = vld [vmem:[%s528_s1] sm:$0xff]  ;;  %351 = vset.pattern.permute.xlu1 %v376_v2  ;;  %350 = vset.pattern.permute.xlu0 %v376_v2  ;;  %v99_v3 = vld [vmem:[%s528_s1 + $0x18] sm:$0xff] }
   0x2   :  { %120 = vperm.xlu1 %351, %v98_v0   ;;  %114 = vperm.xlu0 %350, %v96_v1   ;;  %v97_v4 = vld [vmem:[%s528_s1 + $0x8] sm:$0xff] }
   0x3   :  { %7 = vsyncpa [#allocation3], 0  ;;  %v101_v5 = vld [vmem:[%s528_s1 + $0x28] sm:$0xff]  ;;  %v100_v6 = vld [vmem:[%s528_s1 + $0x20] sm:$0xff]  ;;  %v111_v16 = vlaneseq  ;;  %vm188_vm0 = vcmask 408576  }
   0x4   :  { %v103_v7 = vld [vmem:[%s528_s1 + $0x38] sm:$0xff]  ;;  %v102_v8 = vld [vmem:[%s528_s1 + $0x30] sm:$0xff]  ;;  %v105_v9 = vld [vmem:[%s528_s1 + $0x48] sm:$0xff] }
   0x5   :  { %v104_v10 = vld [vmem:[%s528_s1 + $0x40] sm:$0xff]  ;;  %v107_v11 = vld [vmem:[%s528_s1 + $0x58] sm:$0xff]  ;;  %v106_v12 = vld [vmem:[%s528_s1 + $0x50] sm:$0xff]  ;;  %v438_v17 = vand.u32 127, %v111_v16 }
   0x6   :  { %123 = vperm.xlu1 %351, %v99_v3   ;;  %117 = vperm.xlu0 %350, %v97_v4   ;;  %v109_v13 = vld [vmem:[%s528_s1 + $0x68] sm:$0xff]  ;;  %v108_v14 = vld [vmem:[%s528_s1 + $0x60] sm:$0xff]  ;;  %v110_v15 = vld [vmem:[%s528_s1 + $0x70] sm:$0xff] }
   0x7   :  { %v81_v18 = vld [vmem:[%s527_s0] sm:$0xff]  ;;  %v82_v23 = vld [vmem:[%s527_s0 + $0x8] sm:$0xff]  ;;  %v84_v24 = vld [vmem:[%s527_s0 + $0x18] sm:$0xff] }
   0x8   :  { %v83_v27 = vld [vmem:[%s527_s0 + $0x10] sm:$0xff]  ;;  %v86_v32 = vld [vmem:[%s527_s0 + $0x28] sm:$0xff]  ;;  %v85_v36 = vld [vmem:[%s527_s0 + $0x20] sm:$0xff] }
   0x9   :  { %v88_v40 = vld [vmem:[%s527_s0 + $0x38] sm:$0xff]  ;;  %v87_v44 = vld [vmem:[%s527_s0 + $0x30] sm:$0xff]  ;;  %v90_v48 = vld [vmem:[%s527_s0 + $0x48] sm:$0xff] }
   0xa   :  { %129 = vperm.xlu1 %351, %v101_v5   ;;  %126 = vperm.xlu0 %350, %v100_v6   ;;  %v89_v52 = vld [vmem:[%s527_s0 + $0x40] sm:$0xff]  ;;  %v92_v56 = vld [vmem:[%s527_s0 + $0x58] sm:$0xff]  ;;  %v91_v60 = vld [vmem:[%s527_s0 + $0x50] sm:$0xff] }
   0xb   :  { %v94_v0 = vld [vmem:[%s527_s0 + $0x68] sm:$0xff]  ;;  %v93_v4 = vld [vmem:[%s527_s0 + $0x60] sm:$0xff] }
   0xe   :  { %135 = vperm.xlu1 %351, %v103_v7   ;;  %132 = vperm.xlu0 %350, %v102_v8  }
  0x12   :  { %141 = vperm.xlu1 %351, %v105_v9   ;;  %138 = vperm.xlu0 %350, %v104_v10   ;;  %v95_v10 = vld [vmem:[%s527_s0 + $0x70] sm:$0xff]  ;;  %s377_s0 = smov [#allocation2]  }
  0x13   :  { %s327_s12 = sshll.u32 %s377_s0, 4  ;;  %s328_s12 = int_to_ptr.vmem [resolvable:$true] %s327_s12 }
  0x14   :  { %s352_s13 = scalar_lea.vmem %s328_s12, 128  ;;  %p357_p1 = scmp.lt.s32.totalorder %s328_s12, %s328_s12 }
  0x15   :  { %p353_p0 = scmp.ne.s32.totalorder %s328_s12, %s352_s13  ;;  %p358_p2 = scmp.lt.s32.totalorder %s352_s13, %s352_s13 }
  0x16   :  { %147 = vperm.xlu1 %351, %v107_v11   ;;  %144 = vperm.xlu0 %350, %v106_v12  }
  0x17   :  { %p359_p3 = por %p358_p2, %p357_p1 }
  0x19   :  { %p360_p4 = pnand %p359_p3, %p353_p0 }
  0x1a   :  { %153 = vperm.xlu1 %351, %v109_v13   ;;  %150 = vperm.xlu0 %350, %v108_v14  }
  0x1e   :  { %156 = vperm.xlu0 %350, %v110_v15  }
  0x81   :  { %v121_v19 = vpop.permute.xlu1 %120  ;;  %v115_v20 = vpop.permute.xlu0 %114 }
  0x82   :  { %vm158_vm1 = vcmp.eq.s32.totalorder %v438_v17, %v115_v20  ;;  %vm160_vm2 = vcmp.eq.s32.totalorder %v438_v17, %v121_v19 }
  0x83   :  { %v173_v21 = vsel %vm158_vm1, %v81_v18, 0.0  ;;  %v175_v35 = vsel %vm160_vm2, %v83_v27, 0.0 }
  0x84   :  { %v189_v22 = vsel %vm188_vm0, %v173_v21, 0.0  ;;  %v195_v38 = vsel %vm188_vm0, %v175_v35, 0.0 }
  0x85   :  { %v124_v25 = vpop.permute.xlu1 %123  ;;  %v118_v26 = vpop.permute.xlu0 %117  ;;  %190 = vadd.xlane.f32.xlu1 %v189_v22 }
  0x86   :  { %vm161_vm3 = vcmp.eq.s32.totalorder %v438_v17, %v124_v25  ;;  %vm159_vm4 = vcmp.eq.s32.totalorder %v438_v17, %v118_v26 }
  0x87   :  { %v174_v28 = vsel %vm159_vm4, %v82_v23, 0.0  ;;  %v176_v29 = vsel %vm161_vm3, %v84_v24, 0.0 }
  0x88   :  { %v192_v30 = vsel %vm188_vm0, %v174_v28, 0.0  ;;  %v198_v31 = vsel %vm188_vm0, %v176_v29, 0.0 }
  0x89   :  { %v130_v33 = vpop.permute.xlu1 %129  ;;  %v127_v34 = vpop.permute.xlu0 %126  ;;  %193 = vadd.xlane.f32.xlu0 %v192_v30  ;;  %199 = vadd.xlane.f32.xlu1 %v198_v31 }
  0x8a   :  { %vm163_vm5 = vcmp.eq.s32.totalorder %v438_v17, %v130_v33  ;;  %vm162_vm6 = vcmp.eq.s32.totalorder %v438_v17, %v127_v34 }
  0x8b   :  { %v178_v37 = vsel %vm163_vm5, %v86_v32, 0.0  ;;  %v177_v43 = vsel %vm162_vm6, %v85_v36, 0.0 }
  0x8c   :  { %v204_v39 = vsel %vm188_vm0, %v178_v37, 0.0  ;;  %v201_v46 = vsel %vm188_vm0, %v177_v43, 0.0 }
  0x8d   :  { %v136_v41 = vpop.permute.xlu1 %135  ;;  %v133_v42 = vpop.permute.xlu0 %132  ;;  %196 = vadd.xlane.f32.xlu0 %v195_v38  ;;  %205 = vadd.xlane.f32.xlu1 %v204_v39 }
  0x8e   :  { %vm165_vm7 = vcmp.eq.s32.totalorder %v438_v17, %v136_v41  ;;  %vm164_vm8 = vcmp.eq.s32.totalorder %v438_v17, %v133_v42 }
  0x8f   :  { %v180_v45 = vsel %vm165_vm7, %v88_v40, 0.0  ;;  %v179_v51 = vsel %vm164_vm8, %v87_v44, 0.0 }
  0x90   :  { %v210_v47 = vsel %vm188_vm0, %v180_v45, 0.0  ;;  %v207_v54 = vsel %vm188_vm0, %v179_v51, 0.0 }
  0x91   :  { %v142_v49 = vpop.permute.xlu1 %141  ;;  %v139_v50 = vpop.permute.xlu0 %138  ;;  %202 = vadd.xlane.f32.xlu0 %v201_v46  ;;  %211 = vadd.xlane.f32.xlu1 %v210_v47 }
  0x92   :  { %vm167_vm9 = vcmp.eq.s32.totalorder %v438_v17, %v142_v49  ;;  %vm166_vm10 = vcmp.eq.s32.totalorder %v438_v17, %v139_v50 }
  0x93   :  { %v182_v53 = vsel %vm167_vm9, %v90_v48, 0.0  ;;  %v181_v59 = vsel %vm166_vm10, %v89_v52, 0.0 }
  0x94   :  { %v216_v55 = vsel %vm188_vm0, %v182_v53, 0.0  ;;  %v213_v62 = vsel %vm188_vm0, %v181_v59, 0.0 }
  0x95   :  { %v148_v57 = vpop.permute.xlu1 %147  ;;  %v145_v58 = vpop.permute.xlu0 %144  ;;  %208 = vadd.xlane.f32.xlu0 %v207_v54  ;;  %217 = vadd.xlane.f32.xlu1 %v216_v55 }
  0x96   :  { %vm169_vm11 = vcmp.eq.s32.totalorder %v438_v17, %v148_v57  ;;  %vm168_vm12 = vcmp.eq.s32.totalorder %v438_v17, %v145_v58 }
  0x97   :  { %v184_v61 = vsel %vm169_vm11, %v92_v56, 0.0  ;;  %v183_v3 = vsel %vm168_vm12, %v91_v60, 0.0 }
  0x98   :  { %v222_v63 = vsel %vm188_vm0, %v184_v61, 0.0  ;;  %v219_v6 = vsel %vm188_vm0, %v183_v3, 0.0 }
  0x99   :  { %v154_v1 = vpop.permute.xlu1 %153  ;;  %v151_v2 = vpop.permute.xlu0 %150  ;;  %214 = vadd.xlane.f32.xlu0 %v213_v62  ;;  %223 = vadd.xlane.f32.xlu1 %v222_v63 }
  0x9a   :  { %vm171_vm13 = vcmp.eq.s32.totalorder %v438_v17, %v154_v1  ;;  %vm170_vm14 = vcmp.eq.s32.totalorder %v438_v17, %v151_v2 }
  0x9b   :  { %v186_v5 = vsel %vm171_vm13, %v94_v0, 0.0  ;;  %v185_v9 = vsel %vm170_vm14, %v93_v4, 0.0 }
  0x9c   :  { %v228_v7 = vsel %vm188_vm0, %v186_v5, 0.0  ;;  %v225_v11 = vsel %vm188_vm0, %v185_v9, 0.0 }
  0x9d   :  { %v157_v8 = vpop.permute.xlu0 %156  ;;  %220 = vadd.xlane.f32.xlu0 %v219_v6  ;;  %229 = vadd.xlane.f32.xlu1 %v228_v7 }
  0x9e   :  { %vm172_vm15 = vcmp.eq.s32.totalorder %v438_v17, %v157_v8 }
  0x9f   :  { %v187_v12 = vsel %vm172_vm15, %v95_v10, 0.0 }
  0xa0   :  { %v231_v13 = vsel %vm188_vm0, %v187_v12, 0.0 }
  0xa1   :  { %226 = vadd.xlane.f32.xlu0 %v225_v11 }
  0xa5   :  { %232 = vadd.xlane.f32.xlu0 %v231_v13 }
 0x112   :  { %v191_v14 = vpop.xlane.xlu1 %190 }
 0x116   :  { %v194_v15 = vpop.xlane.xlu0 %193  ;;  %v200_v16 = vpop.xlane.xlu1 %199 }
 0x117   :  { %v298_v18 = vadd.f32 %v194_v15, %v191_v14 }
 0x11a   :  { %v197_v19 = vpop.xlane.xlu0 %196  ;;  %v206_v20 = vpop.xlane.xlu1 %205 }
 0x11b   :  { %v299_v21 = vadd.f32 %v298_v18, %v197_v19 }
 0x11d   :  { %v300_v22 = vadd.f32 %v299_v21, %v200_v16 }
 0x11e   :  { %v203_v17 = vpop.xlane.xlu0 %202  ;;  %v212_v23 = vpop.xlane.xlu1 %211 }
 0x11f   :  { %v301_v24 = vadd.f32 %v300_v22, %v203_v17 }
 0x121   :  { %v302_v25 = vadd.f32 %v301_v24, %v206_v20 }
 0x122   :  { %v209_v26 = vpop.xlane.xlu0 %208  ;;  %v218_v28 = vpop.xlane.xlu1 %217 }
 0x123   :  { %v303_v27 = vadd.f32 %v302_v25, %v209_v26 }
 0x125   :  { %v304_v29 = vadd.f32 %v303_v27, %v212_v23 }
 0x126   :  { %v215_v30 = vpop.xlane.xlu0 %214  ;;  %v224_v33 = vpop.xlane.xlu1 %223 }
 0x127   :  { %v305_v31 = vadd.f32 %v304_v29, %v215_v30 }
 0x129   :  { %v306_v32 = vadd.f32 %v305_v31, %v218_v28 }
 0x12a   :  { %v221_v34 = vpop.xlane.xlu0 %220  ;;  %v230_v39 = vpop.xlane.xlu1 %229 }
 0x12b   :  { %v307_v35 = vadd.f32 %v306_v32, %v221_v34 }
 0x12d   :  { %v308_v36 = vadd.f32 %v307_v35, %v224_v33 }
 0x12e   :  { %v227_v37 = vpop.xlane.xlu0 %226 }
 0x12f   :  { %v309_v38 = vadd.f32 %v308_v36, %v227_v37 }
 0x131   :  { %v310_v40 = vadd.f32 %v309_v38, %v230_v39 }
 0x132   :  { %v233_v41 = vpop.xlane.xlu0 %232 }
 0x133   :  { %v311_v42 = vadd.f32 %v310_v40, %v233_v41 }
 0x135   :  { %v312_v43 = vrot.slane %v311_v42, 4 }
 0x137   :  { %v313_v44 = vadd.f32 %v312_v43, %v311_v42 }
 0x139   :  { %v314_v45 = vrot.slane %v313_v44, 2 }
 0x13b   :  { %v315_v46 = vadd.f32 %v314_v45, %v313_v44 }
 0x13d   :  { %v316_v47 = vrot.slane %v315_v46, 1 }
 0x13f   :  { %v317_v48 = vadd.f32 %v316_v47, %v315_v46 }
 0x141   :  { %320 = vst [vmem:[#allocation2] sm:$0xff] %v317_v48 }
 0x142   :  { %363 = shalt.err (!%p360_p4)
}
 0x143   :  { %s364_s15 = scalar_lea.hbm %s529_s2, 128 }
 0x144   :  { %p365_p5 = scmp.ne.s32.totalorder %s529_s2, %s364_s15  ;;  %p368_p6 = scmp.lt.u32.totalorder %s364_s15, %s529_s2 }
 0x146   :  { %p370_p7 = pnand %p368_p6, %p365_p5 }
 0x148   :  { %373 = shalt.err (!%p370_p7)
}
 0x149   :  { %330 = dma.vmem_to_hbm [thread:$0]  %s328_s12, 128, %s529_s2, [#allocation3]  }
 0x14a   :  { %374 = dma.done.wait [#allocation3], 128  }
 0x14b   :  { %375 = vsyncadd [#allocation3], 4294967168 }
 0x14c   :  { %334 = vsyncpa [#allocation3], 1 }

</bundles_post_ra>
